<compile_context>
chip_gen: v7x
topology: tpu7x:2x2x1
jax: 0.10.0
libtpu: 0.0.40
codegen_flags: <defaults>
</compile_context>

<pallas_src>
import math

import jax
import jax.numpy as jnp
from jax import lax
from jax.experimental import pallas as pl
from jax.experimental.pallas import tpu as pltpu


def _round_up(x, m):
    return (x + m - 1) // m * m


# ---------------------------------------------------------------------------
# Kernel: one row-tile of  LayerNorm(dense(x) + residual)
# ---------------------------------------------------------------------------
def bert_output_kernel(x_ref, r_ref, w_ref, b_ref, g_ref, beta_ref, o_ref):
    # Dense: activations cast to bf16 in VMEM (no extra wrapper pass over the
    # largest tensor), bf16 weights, f32 accumulation on the MXU.
    h = jnp.dot(
        x_ref[...].astype(jnp.bfloat16),
        w_ref[...],
        preferred_element_type=jnp.float32,
    )
    # TODO(synk): dropout omitted (eval / inference mode); training would add
    #             a pltpu.prng_seed + pltpu.stateful_bernoulli mask here.
    h = h + b_ref[...] + r_ref[...].astype(jnp.float32)

    # LayerNorm over the hidden (lane) dim, eps = 1e-12, f32 statistics.
    # One-pass variance (E[x^2] - E[x]^2) saves a tm*H VPU pass per step.
    mean = jnp.mean(h, axis=-1, keepdims=True)
    var = jnp.maximum(jnp.mean(h * h, axis=-1, keepdims=True) - mean * mean, 0.0)
    h = (h - mean) * lax.rsqrt(var + 1e-12)
    o_ref[...] = (h * g_ref[...] + beta_ref[...]).astype(o_ref.dtype)


# ---------------------------------------------------------------------------
# Tile / VMEM budgeting helpers
# ---------------------------------------------------------------------------
def _pick_row_tile(n_rows, tm_req):
    """Row tile: multiple of 16 (covers f32 and bf16 sublane tiles), large
    enough to amortize the ~0.35us per-grid-step overhead, preferring a tile
    that divides the row count (no jnp.pad HBM copy) and keeping >= 2 grid
    steps so v7x's two TensorCores both get work."""
    n16 = _round_up(n_rows, 16)
    tm = min(_round_up(max(tm_req, 16), 16), n16)
    if n16 % tm:
        # Prefer a dividing tile (>= 256 rows to keep the MXU M dim fed)
        # over materializing padded copies of the inputs in HBM.
        div = next((c for c in range(tm - 16, 255, -16) if n16 % c == 0), None)
        if div is not None:
            tm = div
    # v7x megacore: the 1-D "parallel" grid is sharded across 2 TensorCores;
    # a single grid step would idle half the chip when there is enough work.
    if tm == n16 and n16 >= 512 and n16 % 32 == 0:
        tm = n16 // 2
    return tm


def _default_vmem_limit_bytes():
    # Clear the conservative per-chip scoped-VMEM defaults (16 MiB on v5e,
    # 32 MiB on v6e/v7x).  48 MiB is safe on v7x's 64 MiB/TC physical VMEM;
    # on v5e/v6e (128 MiB physical) allow extra headroom for bigger tiles.
    try:
        cap = int(pltpu.get_tpu_info().vmem_capacity_bytes)
    except Exception:
        cap = 64 << 20
    return (96 << 20) if cap >= (128 << 20) else (48 << 20)


# ---------------------------------------------------------------------------
# Wrapper
# ---------------------------------------------------------------------------
def bert_output(hidden_states, input_tensor, params, *, tm=512):
    """BertOutput forward (eval mode: dropout == identity).

    hidden_states: [B, S, I]   intermediate activations (f32 or bf16)
    input_tensor:  [B, S, H]   residual input (f32 or bf16)
    params: dense_w (I, H), dense_b (H,), ln_g (H,), ln_b (H,)
    Returns [B, S, H] in input_tensor.dtype.
    """
    out_dtype = input_tensor.dtype
    B, S, I = hidden_states.shape
    H = input_tensor.shape[-1]
    N = B * S

    # Keep inputs in their native dtype: bf16 / f32 conversion happens inside
    # the kernel, so there is no extra full-array XLA cast pass in the wrapper
    # and the residual is DMA'd at its native width.
    x = hidden_states.reshape(N, I)
    r = input_tensor.reshape(N, H)

    tm = _pick_row_tile(N, tm)
    n_pad = _round_up(N, tm)
    if n_pad != N:
        # Fallback only (production B*S normally divides tm).  Padded rows
        # come out of LayerNorm as ln_b and are sliced off below — harmless.
        x = jnp.pad(x, ((0, n_pad - N), (0, 0)))
        r = jnp.pad(r, ((0, n_pad - N), (0, 0)))

    w = params["dense_w"].astype(jnp.bfloat16)               # (I, H), MXU dtype
    b = params["dense_b"].reshape(1, H).astype(jnp.float32)
    g = params["ln_g"].reshape(1, H).astype(jnp.float32)
    beta = params["ln_b"].reshape(1, H).astype(jnp.float32)

    bytes_accessed = (
        n_pad * I * jnp.dtype(x.dtype).itemsize               # activations
        + I * H * 2                                           # bf16 weight (resident)
        + n_pad * H * jnp.dtype(r.dtype).itemsize             # residual
        + n_pad * H * jnp.dtype(out_dtype).itemsize           # output
        + 3 * H * 4                                           # bias / gamma / beta
    )

    out = pl.pallas_call(
        bert_output_kernel,
        out_shape=jax.ShapeDtypeStruct((n_pad, H), out_dtype),
        grid=(n_pad // tm,),
        in_specs=[
            pl.BlockSpec((tm, I), lambda i: (i, 0)),          # activations (row tiled)
            pl.BlockSpec((tm, H), lambda i: (i, 0)),          # residual (row tiled)
            # Weight block never changes across the grid: single-buffer it so
            # the resident 8 MiB (BERT-large) does not burn 2x VMEM on v7x.
            pl.BlockSpec((I, H), lambda i: (0, 0),
                         pipeline_mode=pl.Buffered(buffer_count=1)),
            pl.BlockSpec((1, H), lambda i: (0, 0)),           # dense bias
            pl.BlockSpec((1, H), lambda i: (0, 0)),           # LN gamma
            pl.BlockSpec((1, H), lambda i: (0, 0)),           # LN beta
        ],
        out_specs=pl.BlockSpec((tm, H), lambda i: (i, 0)),
        compiler_params=pltpu.CompilerParams(
            dimension_semantics=("parallel",),                # megacore-shardable
            vmem_limit_bytes=_default_vmem_limit_bytes(),
        ),
        cost_estimate=pl.CostEstimate(
            flops=2 * n_pad * I * H,
            transcendentals=n_pad,                            # one rsqrt per row
            bytes_accessed=bytes_accessed,
        ),
    )(x, r, w, b, g, beta)

    return out[:N].reshape(B, S, H)


# ---------------------------------------------------------------------------
# Pure-JAX references (for correctness sanity checks)
# ---------------------------------------------------------------------------
def reference_bf16(hidden_states, input_tensor, params):
    # Same numerics recipe as the kernel: bf16 matmul operands, f32 accumulate.
    h = jnp.dot(
        hidden_states.astype(jnp.bfloat16),
        params["dense_w"].astype(jnp.bfloat16),
        preferred_element_type=jnp.float32,
    ) + params["dense_b"]
    h = h + input_tensor.astype(jnp.float32)
    mean = jnp.mean(h, axis=-1, keepdims=True)
    var = jnp.mean(jnp.square(h - mean), axis=-1, keepdims=True)
    return (h - mean) / jnp.sqrt(var + 1e-12) * params["ln_g"] + params["ln_b"]


def reference_f32(hidden_states, input_tensor, params):
    h = hidden_states @ params["dense_w"] + params["dense_b"]
    h = h + input_tensor
    mean = jnp.mean(h, axis=-1, keepdims=True)
    var = jnp.mean(jnp.square(h - mean), axis=-1, keepdims=True)
    return (h - mean) / jnp.sqrt(var + 1e-12) * params["ln_g"] + params["ln_b"]


# ---------------------------------------------------------------------------
# Main
# ---------------------------------------------------------------------------
if __name__ == "__main__":
    # Small BERT-like shapes: hidden H, intermediate I = 4*H.
    B, S, H, I = 2, 8, 128, 512

    key = jax.random.PRNGKey(0)
    ks = jax.random.split(key, 4)

    # nn.Linear(I, H): weight (H, I); we store its transpose so out = x @ W.
    dense_w = jax.random.normal(ks[0], (I, H), jnp.float32) * 0.02
    dense_b = jax.random.normal(ks[1], (H,), jnp.float32) * 0.02
    ln_g = jnp.ones((H,), jnp.float32)
    ln_b = jnp.zeros((H,), jnp.float32)
    params = dict(dense_w=dense_w, dense_b=dense_b, ln_g=ln_g, ln_b=ln_b)

    hidden_states = jax.random.normal(ks[2], (B, S, I), jnp.float32)
    input_tensor = jax.random.normal(ks[3], (B, S, H), jnp.float32)

    out = bert_output(hidden_states, input_tensor, params)
    jax.block_until_ready(out)

    ref_bf16 = reference_bf16(hidden_states, input_tensor, params)
    ref_f32 = reference_f32(hidden_states, input_tensor, params)

    assert out.shape == (B, S, H)
    assert out.dtype == input_tensor.dtype
    assert jnp.allclose(out.astype(jnp.float32), ref_bf16, atol=2e-3, rtol=2e-3)
    assert jnp.allclose(out.astype(jnp.float32), ref_f32, atol=5e-2, rtol=5e-2)

    print("KERNEL_OK")
</pallas_src>

<mosaic_0001>
module attributes {stable_mosaic.version = 11 : i64} {
  func.func @bert_output_kernel(%arg0: i32, %arg1: memref<16x512xf32, #tpu.memory_space<vmem>>, %arg2: memref<16x128xf32, #tpu.memory_space<vmem>>, %arg3: memref<512x128xbf16, #tpu.memory_space<vmem>>, %arg4: memref<1x128xf32, #tpu.memory_space<vmem>>, %arg5: memref<1x128xf32, #tpu.memory_space<vmem>>, %arg6: memref<1x128xf32, #tpu.memory_space<vmem>>, %arg7: memref<16x128xf32, #tpu.memory_space<vmem>>) attributes {dimension_semantics = [#tpu.dimension_semantics<parallel>], iteration_bounds = array<i64: 1>, scalar_prefetch = 0 : i64, scratch_operands = 0 : i64, tpu.core_type = #tpu.core_type<tc>, window_params = [{transform_indices = @transform_0, window_bounds = array<i64: 16, 512>}, {transform_indices = @transform_1, window_bounds = array<i64: 16, 128>}, {pipeline_mode = #tpu.pipeline_mode<synchronous>, transform_indices = @transform_2, window_bounds = array<i64: 512, 128>}, {pipeline_mode = #tpu.pipeline_mode<synchronous>, transform_indices = @transform_3, window_bounds = array<i64: 1, 128>}, {pipeline_mode = #tpu.pipeline_mode<synchronous>, transform_indices = @transform_4, window_bounds = array<i64: 1, 128>}, {pipeline_mode = #tpu.pipeline_mode<synchronous>, transform_indices = @transform_5, window_bounds = array<i64: 1, 128>}, {transform_indices = @transform_6, window_bounds = array<i64: 16, 128>}]} {
    %c0 = arith.constant 0 : index
    %c0_0 = arith.constant 0 : index
    %0 = vector.load %arg1[%c0, %c0_0] : memref<16x512xf32, #tpu.memory_space<vmem>>, vector<16x512xf32>
    %1 = arith.truncf %0 : vector<16x512xf32> to vector<16x512xbf16>
    %c0_1 = arith.constant 0 : index
    %c0_2 = arith.constant 0 : index
    %2 = vector.load %arg3[%c0_1, %c0_2] : memref<512x128xbf16, #tpu.memory_space<vmem>>, vector<512x128xbf16>
    %cst = arith.constant dense<0.000000e+00> : vector<16x128xf32>
    %3 = tpu.matmul %1, %2, %cst {dimension_numbers = #tpu.dot_dimension_numbers<[1], [0], [0], [1], [0, 0, 1, 1], [], []>} : vector<16x512xbf16>, vector<512x128xbf16>, vector<16x128xf32> -> vector<16x128xf32>
    %c0_3 = arith.constant 0 : index
    %c0_4 = arith.constant 0 : index
    %4 = vector.load %arg4[%c0_3, %c0_4] : memref<1x128xf32, #tpu.memory_space<vmem>>, vector<1x128xf32>
    %5 = vector.broadcast %4 : vector<1x128xf32> to vector<16x128xf32>
    %6 = arith.addf %3, %5 : vector<16x128xf32>
    %c0_5 = arith.constant 0 : index
    %c0_6 = arith.constant 0 : index
    %7 = vector.load %arg2[%c0_5, %c0_6] : memref<16x128xf32, #tpu.memory_space<vmem>>, vector<16x128xf32>
    %8 = arith.addf %6, %7 : vector<16x128xf32>
    %cst_7 = arith.constant dense<0.000000e+00> : vector<16xf32>
    %9 = vector.multi_reduction <add>, %8, %cst_7 [1] : vector<16x128xf32> to vector<16xf32>
    %10 = vector.shape_cast %9 : vector<16xf32> to vector<16x1xf32>
    %cst_8 = arith.constant 1.280000e+02 : f32
    %11 = vector.broadcast %cst_8 : f32 to vector<16x1xf32>
    %12 = arith.divf %10, %11 : vector<16x1xf32>
    %13 = arith.mulf %8, %8 : vector<16x128xf32>
    %cst_9 = arith.constant dense<0.000000e+00> : vector<16xf32>
    %14 = vector.multi_reduction <add>, %13, %cst_9 [1] : vector<16x128xf32> to vector<16xf32>
    %15 = vector.shape_cast %14 : vector<16xf32> to vector<16x1xf32>
    %cst_10 = arith.constant 1.280000e+02 : f32
    %16 = vector.broadcast %cst_10 : f32 to vector<16x1xf32>
    %17 = arith.divf %15, %16 : vector<16x1xf32>
    %18 = arith.mulf %12, %12 : vector<16x1xf32>
    %19 = arith.subf %17, %18 : vector<16x1xf32>
    %cst_11 = arith.constant 0.000000e+00 : f32
    %20 = vector.broadcast %cst_11 : f32 to vector<16x1xf32>
    %21 = arith.maximumf %19, %20 : vector<16x1xf32>
    %22 = vector.broadcast %12 : vector<16x1xf32> to vector<16x128xf32>
    %23 = arith.subf %8, %22 : vector<16x128xf32>
    %cst_12 = arith.constant 9.99999996E-13 : f32
    %24 = vector.broadcast %cst_12 : f32 to vector<16x1xf32>
    %25 = arith.addf %21, %24 : vector<16x1xf32>
    %26 = math.rsqrt %25 : vector<16x1xf32>
    %27 = vector.broadcast %26 : vector<16x1xf32> to vector<16x128xf32>
    %28 = arith.mulf %23, %27 : vector<16x128xf32>
    %c0_13 = arith.constant 0 : index
    %c0_14 = arith.constant 0 : index
    %29 = vector.load %arg5[%c0_13, %c0_14] : memref<1x128xf32, #tpu.memory_space<vmem>>, vector<1x128xf32>
    %30 = vector.broadcast %29 : vector<1x128xf32> to vector<16x128xf32>
    %31 = arith.mulf %28, %30 : vector<16x128xf32>
    %c0_15 = arith.constant 0 : index
    %c0_16 = arith.constant 0 : index
    %32 = vector.load %arg6[%c0_15, %c0_16] : memref<1x128xf32, #tpu.memory_space<vmem>>, vector<1x128xf32>
    %33 = vector.broadcast %32 : vector<1x128xf32> to vector<16x128xf32>
    %34 = arith.addf %31, %33 : vector<16x128xf32>
    %c0_17 = arith.constant 0 : index
    %c0_18 = arith.constant 0 : index
    %35 = vector.load %arg7[%c0_17, %c0_18] : memref<16x128xf32, #tpu.memory_space<vmem>>, vector<16x128xf32>
    tpu.vector_store %arg7[%c0_17, %c0_18], %34 {strides = array<i32>} : memref<16x128xf32, #tpu.memory_space<vmem>>, vector<16x128xf32>,
    return
  }
  func.func @transform_0(%arg0: i32) -> (i32, i32) {
    %c0_i32 = arith.constant 0 : i32
    %c0_i32_0 = arith.constant 0 : i32
    return %arg0, %c0_i32 : i32, i32
  }
  func.func @transform_1(%arg0: i32) -> (i32, i32) {
    %c0_i32 = arith.constant 0 : i32
    %c0_i32_0 = arith.constant 0 : i32
    return %arg0, %c0_i32 : i32, i32
  }
  func.func @transform_2(%arg0: i32) -> (i32, i32) {
    %c0_i32 = arith.constant 0 : i32
    %c0_i32_0 = arith.constant 0 : i32
    %c0_i32_1 = arith.constant 0 : i32
    return %c0_i32, %c0_i32_0 : i32, i32
  }
  func.func @transform_3(%arg0: i32) -> (i32, i32) {
    %c0_i32 = arith.constant 0 : i32
    %c0_i32_0 = arith.constant 0 : i32
    %c0_i32_1 = arith.constant 0 : i32
    return %c0_i32, %c0_i32_0 : i32, i32
  }
  func.func @transform_4(%arg0: i32) -> (i32, i32) {
    %c0_i32 = arith.constant 0 : i32
    %c0_i32_0 = arith.constant 0 : i32
    %c0_i32_1 = arith.constant 0 : i32
    return %c0_i32, %c0_i32_0 : i32, i32
  }
  func.func @transform_5(%arg0: i32) -> (i32, i32) {
    %c0_i32 = arith.constant 0 : i32
    %c0_i32_0 = arith.constant 0 : i32
    %c0_i32_1 = arith.constant 0 : i32
    return %c0_i32, %c0_i32_0 : i32, i32
  }
  func.func @transform_6(%arg0: i32) -> (i32, i32) {
    %c0_i32 = arith.constant 0 : i32
    %c0_i32_0 = arith.constant 0 : i32
    return %arg0, %c0_i32 : i32, i32
  }
}

</mosaic_0001>

<bundles_post_ra>
// kernel: tpu_custom_call.1
= control target key start
LH: loop header
LB: loop body
LE: loop exit
PB: predicated region body
PF: predicated region fallthrough
CT: control target
= control target key end

     0   :  { %11 = vsyncpa [#allocation3], 0  ;;  %s821_s0 = inlined_call_operand.hbm [shape: f32[16,512], index: 0, kind: input, shape index: {}]   ;;  %s822_s1 = inlined_call_operand.hbm [shape: f32[16,128], index: 1, kind: input, shape index: {}]   ;;  %s823_s2 = inlined_call_operand.hbm [shape: bf16[512,128], index: 2, kind: input, shape index: {}]   ;;  %s824_s3 = inlined_call_operand.vmem [shape: f32[1,128], index: 3, kind: input, shape index: {}]   ;;  %s825_s4 = inlined_call_operand.vmem [shape: f32[1,128], index: 4, kind: input, shape index: {}]   ;;  %s826_s5 = inlined_call_operand.vmem [shape: f32[1,128], index: 5, kind: input, shape index: {}]   ;;  %s827_s6 = inlined_call_operand.hbm [shape: f32[16,128], index: 6, kind: output, shape index: {}]  }
   0x1   :  { %12 = vsyncpa [#allocation6], 0 }
   0x2   :  { %13 = vsyncpa [#allocation4], 0  ;;  %s713_s21 = smov [#allocation5]   ;;  %s619_s25 = scalar_lea.hbm %s822_s1, 256 }
   0x3   :  { %s31_s22 = sshll.u32 %s713_s21, 4  ;;  %p620_p0 = scmp.ne.s32.totalorder %s822_s1, %s619_s25  ;;  %s32_s22 = int_to_ptr.vmem [resolvable:$true] %s31_s22 }
   0x4   :  { %p623_p1 = scmp.lt.u32.totalorder %s619_s25, %s822_s1 }
   0x6   :  { %p625_p2 = pnand %p623_p1, %p620_p0 }
   0x8   :  { %628 = shalt.err (!%p625_p2)
}
   0x9   :  { %s629_s30 = scalar_lea.vmem %s32_s22, 256  ;;  %p634_p4 = scmp.lt.s32.totalorder %s32_s22, %s32_s22 }
   0xa   :  { %p630_p3 = scmp.ne.s32.totalorder %s32_s22, %s629_s30  ;;  %p635_p5 = scmp.lt.s32.totalorder %s629_s30, %s629_s30 }
   0xc   :  { %p636_p6 = por %p635_p5, %p634_p4 }
   0xe   :  { %p637_p7 = pnand %p636_p6, %p630_p3 }
  0x10   :  { %640 = shalt.err (!%p637_p7)
}
  0x11   :  { %s714_s7 = smov 128   ;;  %s715_s8 = smov 8  }
  0x12   :  { %37 = dma.hbm_to_vmem [thread:$0]  %s822_s1, 256, %s32_s22, [#allocation6], %s714_s7, %s714_s7, %s715_s8  }
  0x13   :  { %s716_s11 = smov [#allocation2]   ;;  %s641_s15 = scalar_lea.hbm %s821_s0, 1024 }
  0x14   :  { %s19_s12 = sshll.u32 %s716_s11, 4  ;;  %p642_p8 = scmp.ne.s32.totalorder %s821_s0, %s641_s15  ;;  %s20_s12 = int_to_ptr.vmem [resolvable:$true] %s19_s12 }
  0x15   :  { %p645_p9 = scmp.lt.u32.totalorder %s641_s15, %s821_s0 }
  0x17   :  { %p647_p10 = pnand %p645_p9, %p642_p8 }
  0x19   :  { %650 = shalt.err (!%p647_p10)
}
  0x1a   :  { %s651_s20 = scalar_lea.vmem %s20_s12, 1024  ;;  %p656_p12 = scmp.lt.s32.totalorder %s20_s12, %s20_s12 }
  0x1b   :  { %p652_p11 = scmp.ne.s32.totalorder %s20_s12, %s651_s20  ;;  %p657_p13 = scmp.lt.s32.totalorder %s651_s20, %s651_s20 }
  0x1d   :  { %p658_p0 = por %p657_p13, %p656_p12 }
  0x1f   :  { %p659_p1 = pnand %p658_p0, %p652_p11 }
  0x21   :  { %662 = shalt.err (!%p659_p1)
}
  0x22   :  { %s717_s1 = smov 512   ;;  %s718_s21 = smov 32  }
  0x23   :  { %25 = dma.hbm_to_vmem [thread:$0]  %s821_s0, 1024, %s20_s12, [#allocation3], %s717_s1, %s717_s1, %s718_s21  }
  0x24   :  { %s719_s24 = smov [#allocation7]   ;;  %s663_s28 = scalar_lea.hbm %s823_s2, 4096 }
  0x25   :  { %s43_s25 = sshll.u32 %s719_s24, 4  ;;  %p664_p2 = scmp.ne.s32.totalorder %s823_s2, %s663_s28  ;;  %s44_s25 = int_to_ptr.vmem [resolvable:$true] %s43_s25 }
  0x26   :  { %p667_p3 = scmp.lt.u32.totalorder %s663_s28, %s823_s2 }
  0x28   :  { %p669_p4 = pnand %p667_p3, %p664_p2 }
  0x2a   :  { %672 = shalt.err (!%p669_p4)
}
  0x2b   :  { %s673_s11 = scalar_lea.vmem %s44_s25, 4096  ;;  %p678_p6 = scmp.lt.s32.totalorder %s44_s25, %s44_s25 }
  0x2c   :  { %p674_p5 = scmp.ne.s32.totalorder %s44_s25, %s673_s11  ;;  %p679_p7 = scmp.lt.s32.totalorder %s673_s11, %s673_s11 }
  0x2e   :  { %p680_p8 = por %p679_p7, %p678_p6 }
  0x30   :  { %p681_p9 = pnand %p680_p8, %p674_p5 }
  0x32   :  { %684 = shalt.err (!%p681_p9)
}
  0x33   :  { %s720_s0 = smov 64   ;;  %s721_s12 = smov 4  }
  0x34   :  { %49 = dma.hbm_to_vmem [thread:$0]  %s823_s2, 4096, %s44_s25, [#allocation6], %s720_s0, %s720_s0, %s721_s12  }
  0x35   :  { %707 = dma.done.wait [#allocation3], 1024  }
  0x36   :  { %708 = vsyncadd [#allocation3], 4294966272 }
  0x37   :  { %709 = dma.done.wait [#allocation6], 4352  }
  0x38   :  { %710 = vsyncadd [#allocation6], 4294962944  ;;  %v583_v0 = vld [vmem:[#allocation7 + $0x40] sm:$0xff]   ;;  %v587_v4 = vld [vmem:[#allocation7 + $0x48] sm:$0xff]   ;;  %s722_s19 = smov [#allocation8]  }
  0x39   :  { %v584_v1 = vld [vmem:[#allocation7 + $0xc0] sm:$0xff]   ;;  %529 = vmatprep.subr.bf16.mxu0 %v583_v0  ;;  %v588_v5 = vld [vmem:[#allocation7 + $0xc8] sm:$0xff]   ;;  %v591_v8 = vld [vmem:[#allocation7 + $0x50] sm:$0xff]   ;;  %s481_s20 = sshll.u32 %s722_s19, 4  ;;  %s482_s20 = int_to_ptr.vmem [resolvable:$true] %s481_s20 }
  0x3a   :  { %v585_v2 = vld [vmem:[#allocation7] sm:$0xff]   ;;  %551 = vmatprep.subr.bf16.mxu1 %v584_v1  ;;  %v589_v6 = vld [vmem:[#allocation7 + $0x8] sm:$0xff]   ;;  %v592_v9 = vld [vmem:[#allocation7 + $0xd0] sm:$0xff]   ;;  %s685_s1 = scalar_lea.vmem %s482_s20, 256  ;;  %p690_p11 = scmp.lt.s32.totalorder %s482_s20, %s482_s20 }
  0x3b   :  { %v586_v3 = vld [vmem:[#allocation7 + $0x80] sm:$0xff]   ;;  %530 = vmatpush3.bf16.msra.mxu0 %v585_v2  ;;  %v590_v7 = vld [vmem:[#allocation7 + $0x88] sm:$0xff]   ;;  %v593_v10 = vld [vmem:[#allocation7 + $0x10] sm:$0xff]   ;;  %p686_p10 = scmp.ne.s32.totalorder %s482_s20, %s685_s1  ;;  %p691_p12 = scmp.lt.s32.totalorder %s685_s1, %s685_s1 }
  0x3c   :  { %552 = vmatpush3.bf16.msra.mxu1 %v586_v3  ;;  %531 = vmatprep.subr.bf16.mxu0 %v587_v4  ;;  %v594_v11 = vld [vmem:[#allocation7 + $0x90] sm:$0xff]   ;;  %v595_v12 = vld [vmem:[#allocation7 + $0x58] sm:$0xff]   ;;  %v599_v16 = vld [vmem:[#allocation7 + $0x60] sm:$0xff]  }
  0x3d   :  { %553 = vmatprep.subr.bf16.mxu1 %v588_v5  ;;  %v596_v13 = vld [vmem:[#allocation7 + $0xd8] sm:$0xff]   ;;  %v600_v17 = vld [vmem:[#allocation7 + $0xe0] sm:$0xff]   ;;  %v603_v20 = vld [vmem:[#allocation7 + $0x68] sm:$0xff]   ;;  %p692_p13 = por %p691_p12, %p690_p11 }
  0x3e   :  { %v597_v14 = vld [vmem:[#allocation7 + $0x18] sm:$0xff]   ;;  %v601_v18 = vld [vmem:[#allocation7 + $0x20] sm:$0xff]   ;;  %v604_v21 = vld [vmem:[#allocation7 + $0xe8] sm:$0xff]  }
  0x3f   :  { %532 = vmatpush3.bf16.msra.mxu0 %v589_v6  ;;  %v598_v15 = vld [vmem:[#allocation7 + $0x98] sm:$0xff]   ;;  %v602_v19 = vld [vmem:[#allocation7 + $0xa0] sm:$0xff]   ;;  %v605_v22 = vld [vmem:[#allocation7 + $0x28] sm:$0xff]   ;;  %p693_p0 = pnand %p692_p13, %p686_p10 }
  0x40   :  { %554 = vmatpush3.bf16.msra.mxu1 %v590_v7  ;;  %533 = vmatprep.subr.bf16.mxu0 %v591_v8  ;;  %v606_v23 = vld [vmem:[#allocation7 + $0xa8] sm:$0xff]   ;;  %v607_v24 = vld [vmem:[#allocation7 + $0x70] sm:$0xff]   ;;  %v611_v28 = vld [vmem:[#allocation7 + $0x78] sm:$0xff]  }
  0x41   :  { %555 = vmatprep.subr.bf16.mxu1 %v592_v9  ;;  %v608_v25 = vld [vmem:[#allocation7 + $0xf0] sm:$0xff]   ;;  %v612_v29 = vld [vmem:[#allocation7 + $0xf8] sm:$0xff]   ;;  %v69_v34 = vld [vmem:[#allocation2 + $0x18] sm:$0xff] }
  0x42   :  { %v609_v26 = vld [vmem:[#allocation7 + $0x30] sm:$0xff]   ;;  %v613_v30 = vld [vmem:[#allocation7 + $0x38] sm:$0xff]   ;;  %v73_v36 = vld [vmem:[#allocation2 + $0x38] sm:$0xff] }
  0x43   :  { %534 = vmatpush3.bf16.msra.mxu0 %v593_v10  ;;  %v610_v27 = vld [vmem:[#allocation7 + $0xb0] sm:$0xff]   ;;  %v614_v31 = vld [vmem:[#allocation7 + $0xb8] sm:$0xff]   ;;  %v77_v39 = vpack.c.bf16 %v73_v36, %v69_v34  ;;  %v68_v41 = vld [vmem:[#allocation2 + $0x10] sm:$0xff] }
  0x44   :  { %556 = vmatpush3.bf16.msra.mxu1 %v594_v11  ;;  %535 = vmatprep.subr.bf16.mxu0 %v595_v12  ;;  %v67_v32 = vld [vmem:[#allocation2 + $0x8] sm:$0xff]  ;;  %v66_v37 = vld [vmem:[#allocation2] sm:$0xff]  ;;  %v72_v42 = vld [vmem:[#allocation2 + $0x30] sm:$0xff] }
  0x45   :  { %557 = vmatprep.subr.bf16.mxu1 %v596_v13  ;;  %v71_v33 = vld [vmem:[#allocation2 + $0x28] sm:$0xff]  ;;  %v70_v38 = vld [vmem:[#allocation2 + $0x20] sm:$0xff]  ;;  %v76_v43 = vpack.c.bf16 %v72_v42, %v68_v41  ;;  %414 = vmatprep.mubr.bf16.mxu1 %v77_v39 }
  0x46   :  { %v75_v35 = vpack.c.bf16 %v71_v33, %v67_v32  ;;  %v74_v40 = vpack.c.bf16 %v70_v38, %v66_v37  ;;  %v494_v46 = vld [vmem:[%s824_s3] ss:$0 sm:$0xff]  ;;  %v424_v61 = vld [vmem:[#allocation5 + $0x8] sm:$0xff] }
  0x47   :  { %536 = vmatpush3.bf16.msra.mxu0 %v597_v14  ;;  %v423_v58 = vld [vmem:[#allocation5] sm:$0xff] }
  0x48   :  { %558 = vmatpush3.bf16.msra.mxu1 %v598_v15  ;;  %537 = vmatprep.subr.bf16.mxu0 %v599_v16 }
  0x49   :  { %559 = vmatprep.subr.bf16.mxu1 %v600_v17  ;;  %373 = vmatprep.mubr.bf16.mxu0 %v75_v35 }
  0x4b   :  { %538 = vmatpush3.bf16.msra.mxu0 %v601_v18 }
  0x4c   :  { %560 = vmatpush3.bf16.msra.mxu1 %v602_v19  ;;  %539 = vmatprep.subr.bf16.mxu0 %v603_v20 }
  0x4d   :  { %561 = vmatprep.subr.bf16.mxu1 %v604_v21  ;;  %v527_v21 = vld [vmem:[%s825_s4] ss:$0 sm:$0xff] }
  0x4f   :  { %540 = vmatpush3.bf16.msra.mxu0 %v605_v22 }
  0x50   :  { %562 = vmatpush3.bf16.msra.mxu1 %v606_v23  ;;  %541 = vmatprep.subr.bf16.mxu0 %v607_v24  ;;  %v528_v23 = vld [vmem:[%s826_s5] ss:$0 sm:$0xff] }
  0x51   :  { %563 = vmatprep.subr.bf16.mxu1 %v608_v25 }
  0x53   :  { %542 = vmatpush3.bf16.msra.mxu0 %v609_v26 }
  0x54   :  { %564 = vmatpush3.bf16.msra.mxu1 %v610_v27  ;;  %543 = vmatprep.subr.bf16.mxu0 %v611_v28 }
  0x55   :  { %565 = vmatprep.subr.bf16.mxu1 %v612_v29 }
  0x57   :  { %544 = vmatpush3.bf16.msra.mxu0 %v613_v30 }
  0x58   :  { %566 = vmatpush3.bf16.msra.mxu1 %v614_v31 }
  0x5a   :  { %374 = vmatmul.mubr.bf16.vlgmr.msra.gmra.mrb[0].mxu0 %v74_v40 }
  0x5b   :  { %415 = vmatmul.mubr.bf16.vlgmr.msra.gmra.mrb[0].mxu1 %v76_v43 }
 0x12d   :  { %v545_v44 = vpop.f32.mrb[0].mxu0 }
 0x12e   :  { %v567_v45 = vpop.f32.mrb[0].mxu1  ;;  %v546_v47 = vpop.f32.mrb[1].mxu0 }
 0x12f   :  { %v547_v48 = vadd.f32 %v546_v47, %v545_v44  ;;  %v568_v49 = vpop.f32.mrb[1].mxu1  ;;  %v548_v50 = vpop.f32.mrb[2].mxu0 }
 0x130   :  { %v569_v51 = vadd.f32 %v568_v49, %v567_v45  ;;  %v570_v52 = vpop.f32.mrb[2].mxu1  ;;  %v549_v53 = vpop.f32.mrb[3].mxu0 }
 0x131   :  { %v376_v54 = vadd.f32 %v547_v48, %v494_v46  ;;  %v550_v55 = vadd.f32 %v549_v53, %v548_v50  ;;  %v571_v56 = vpop.f32.mrb[3].mxu1 }
 0x132   :  { %v572_v57 = vadd.f32 %v571_v56, %v570_v52 }
 0x133   :  { %v417_v59 = vadd.f32 %v569_v51, %v376_v54  ;;  %v379_v60 = vadd.f32 %v550_v55, %v494_v46 }
 0x135   :  { %v420_v62 = vadd.f32 %v572_v57, %v379_v60  ;;  %v425_v63 = vadd.f32 %v423_v58, %v417_v59 }
 0x137   :  { %427 = vadd.xlane.f32.xlu0 %v425_v63  ;;  %v434_v0 = vmul.f32 %v425_v63, %v425_v63  ;;  %v426_v1 = vadd.f32 %v424_v61, %v420_v62 }
 0x139   :  { %436 = vadd.xlane.f32.xlu1 %v434_v0  ;;  %v435_v2 = vmul.f32 %v426_v1, %v426_v1 }
 0x13b   :  { %429 = vadd.xlane.f32.xlu0 %v426_v1 }
 0x13d   :  { %438 = vadd.xlane.f32.xlu1 %v435_v2 }
 0x1c4   :  { %v428_v3 = vpop.xlane.xlu0 %427 }
 0x1c5   :  { %v432_v4 = vmul.f32 0.0078125, %v428_v3 }
 0x1c6   :  { %v437_v5 = vpop.xlane.xlu1 %436 }
 0x1c7   :  { %v442_v6 = vmul.f32 %v432_v4, %v432_v4  ;;  %v440_v7 = vmul.f32 0.0078125, %v437_v5  ;;  %v448_v19 = vsub.f32 %v425_v63, %v432_v4 }
 0x1c8   :  { %v430_v8 = vpop.xlane.xlu0 %429 }
 0x1c9   :  { %v444_v9 = vsub.f32 %v440_v7, %v442_v6  ;;  %v433_v10 = vmul.f32 0.0078125, %v430_v8 }
 0x1ca   :  { %v439_v11 = vpop.xlane.xlu1 %438 }
 0x1cb   :  { %v446_v12 = vmax.f32 %v444_v9, 0.0  ;;  %v443_v13 = vmul.f32 %v433_v10, %v433_v10  ;;  %v441_v14 = vmul.f32 0.0078125, %v439_v11  ;;  %v449_v24 = vsub.f32 %v426_v1, %v433_v10 }
 0x1cd   :  { %v450_v15 = vadd.f32 1e-12, %v446_v12  ;;  %v445_v16 = vsub.f32 %v441_v14, %v443_v13 }
 0x1cf   :  { %615 = vrsqrt.f32 %v450_v15  ;;  %v447_v17 = vmax.f32 %v445_v16, 0.0 }
 0x1d1   :  { %v451_v18 = vadd.f32 1e-12, %v447_v17 }
 0x1d3   :  { %617 = vrsqrt.f32 %v451_v18 }
 0x1d9   :  { %v616_v20 = vpop.eup %615 }
 0x1da   :  { %v454_v22 = vmul.f32 %v616_v20, %v448_v19 }
 0x1dc   :  { %v463_v25 = vmul.f32 %v527_v21, %v454_v22 }
 0x1dd   :  { %v618_v26 = vpop.eup %617 }
 0x1de   :  { %v455_v27 = vmul.f32 %v618_v26, %v449_v24  ;;  %v472_v28 = vadd.f32 %v528_v23, %v463_v25 }
 0x1e0   :  { %v464_v29 = vmul.f32 %v527_v21, %v455_v27  ;;  %474 = vst [vmem:[#allocation8] sm:$0xff] %v472_v28 }
 0x1e2   :  { %v473_v30 = vadd.f32 %v528_v23, %v464_v29 }
 0x1e4   :  { %475 = vst [vmem:[#allocation8 + $0x8] sm:$0xff] %v473_v30 }
 0x1e5   :  { %696 = shalt.err (!%p693_p0)
}
 0x1e6   :  { %s697_s21 = scalar_lea.hbm %s827_s6, 256 }
 0x1e7   :  { %p698_p1 = scmp.ne.s32.totalorder %s827_s6, %s697_s21  ;;  %p701_p2 = scmp.lt.u32.totalorder %s697_s21, %s827_s6 }
 0x1e9   :  { %p703_p3 = pnand %p701_p2, %p698_p1 }
 0x1eb   :  { %706 = shalt.err (!%p703_p3)
}
 0x1ec   :  { %487 = dma.vmem_to_hbm [thread:$0]  %s482_s20, 256, %s827_s6, [#allocation4], %s714_s7, %s714_s7, %s715_s8  }
 0x1ed   :  { %711 = dma.done.wait [#allocation4], 256  }
 0x1ee   :  { %712 = vsyncadd [#allocation4], 4294967040 }
 0x1ef   :  { %491 = vsyncpa [#allocation3], 1 }
 0x1f0   :  { %492 = vsyncpa [#allocation6], 1 }
 0x1f1   :  { %493 = vsyncpa [#allocation4], 1 }

</bundles_post_ra>
